<compile_context>
chip_gen: v5e
topology: v5e:2x2
jax: 0.10.0
libtpu: 0.0.40
codegen_flags: <defaults>
</compile_context>

<pallas_src>
import jax
import jax.numpy as jnp
from jax import lax
from jax.experimental import pallas as pl
from jax.experimental.pallas import tpu as pltpu

LANES = 128


def _device_kind() -> str:
    try:
        return jax.devices()[0].device_kind.lower()
    except Exception:
        return ""


def _num_tensorcores(kind: str) -> int:
    # v7x exposes 2 TensorCores per device; v4/v5p megacore also presents 2 TCs
    # behind one device.  v5e / v6e are single-TC.
    return 2 if any(tag in kind for tag in ("v7", "v4", "v5p")) else 1


def _target_tile_rows(kind: str) -> int:
    # v7x: 3.2 TB/s HBM -> stream 4 MiB f32 blocks per input to stay near
    # roofline.  v5e/v6e: 1 MiB blocks already reach ~85% of roofline.
    return 8192 if "v7" in kind else 2048


def _sublane_multiple(itemsize: int) -> int:
    # f32 -> 8 sublanes, bf16/f16 -> 16, int8/fp8 -> 32 (packed-dtype minimums).
    return max(8, 32 // max(int(itemsize), 1))


def _make_dice_kernel(tile_rows, tiles_per_split, rows_full, needs_mask):
    """Kernel accumulating per-lane partials of sigmoid(x)*t, sigmoid(x), t."""

    def kernel(x_ref, t_ref, acc_ref):
        i = pl.program_id(1)  # sequential reduction axis

        @pl.when(i == 0)
        def _init():
            acc_ref[...] = jnp.zeros_like(acc_ref)

        x = x_ref[...].astype(jnp.float32)
        t = t_ref[...].astype(jnp.float32)
        s = jax.nn.sigmoid(x)

        if needs_mask:
            # Zero out rows past the logical end of the array (partial last
            # tile of each split / overshoot tiles of a balanced multi-core
            # split).  Cheap VPU selects hidden under the DMA.
            tile_idx = pl.program_id(0) * tiles_per_split + i
            row0 = tile_idx * tile_rows
            rows = row0 + lax.broadcasted_iota(
                jnp.int32, (tile_rows, LANES), 0)
            valid = rows < rows_full
            s = jnp.where(valid, s, 0.0)
            t = jnp.where(valid, t, 0.0)

        inter = jnp.sum(s * t, axis=0, keepdims=True)   # (1, LANES)
        s_sum = jnp.sum(s, axis=0, keepdims=True)       # (1, LANES)
        t_sum = jnp.sum(t, axis=0, keepdims=True)       # (1, LANES)
        # Single merged accumulator block: rows = [inter, sum(s), sum(t)].
        acc_ref[...] += jnp.concatenate([inter, s_sum, t_sum], axis=0)[None]

    return kernel


def _dice_sums_pallas(x2, t2, *, tile_rows, tiles_per_split, num_splits,
                      rows_full, needs_mask, buffer_count, vmem_limit):
    """Returns (sum(sig(x)*t), sum(sig(x)), sum(t)) over all rows_full rows."""
    tiles_total = pl.cdiv(rows_full, tile_rows)
    last_tile = tiles_total - 1

    def in_index(c, i):
        tile = c * tiles_per_split + i
        # Clamp so overshoot tiles of a balanced split never index fully past
        # the array; their contribution is zeroed by the in-kernel row mask.
        return (jnp.minimum(tile, last_tile), 0)

    in_spec = pl.BlockSpec((tile_rows, LANES), in_index)
    if buffer_count is not None and hasattr(pl, "Buffered"):
        try:  # deeper pipelining on v7x; fall back silently if unsupported
            in_spec = pl.BlockSpec((tile_rows, LANES), in_index,
                                   pipeline_mode=pl.Buffered(buffer_count))
        except TypeError:
            in_spec = pl.BlockSpec((tile_rows, LANES), in_index)

    out_spec = pl.BlockSpec((1, 3, LANES), lambda c, i: (c, 0, 0))
    out_shape = jax.ShapeDtypeStruct((num_splits, 3, LANES), jnp.float32)

    compiler_kwargs = dict(dimension_semantics=("parallel", "arbitrary"))
    if vmem_limit is not None:
        compiler_kwargs["vmem_limit_bytes"] = vmem_limit

    acc = pl.pallas_call(
        _make_dice_kernel(tile_rows, tiles_per_split, rows_full, needs_mask),
        out_shape=out_shape,
        grid_spec=pltpu.PrefetchScalarGridSpec(
            num_scalar_prefetch=0,
            grid=(num_splits, tiles_per_split),
            in_specs=[in_spec, in_spec],
            out_specs=out_spec,
        ),
        compiler_params=pltpu.CompilerParams(**compiler_kwargs),
    )(x2, t2)

    # Single cross-split / cross-lane reduction outside the kernel (fused
    # with the rest of the wrapper under jit).
    totals = jnp.sum(acc, axis=(0, 2))  # (3,)
    return totals[0], totals[1], totals[2]


@jax.jit
def dice_loss_old(inputs, targets, smooth=1.0):
    """Pallas equivalent of DiceLoss_old.forward."""
    if inputs.dtype == jnp.bool_:
        inputs = inputs.astype(jnp.float32)
    if targets.dtype == jnp.bool_:
        targets = targets.astype(jnp.float32)

    x = jnp.reshape(inputs, (-1,))
    t = jnp.reshape(targets, (-1,))
    n = x.shape[0]

    kind = _device_kind()
    num_cores = _num_tensorcores(kind)
    target_rows = _target_tile_rows(kind)
    sub_mult = max(_sublane_multiple(x.dtype.itemsize),
                   _sublane_multiple(t.dtype.itemsize))

    rows_full = n // LANES

    inter = jnp.float32(0.0)
    s_in = jnp.float32(0.0)
    s_tgt = jnp.float32(0.0)

    use_kernel = rows_full >= sub_mult
    rows_kernel = rows_full if use_kernel else 0

    if use_kernel:
        tile_rows = min(target_rows, (rows_full // sub_mult) * sub_mult)
        tiles_total = pl.cdiv(rows_full, tile_rows)
        num_splits = num_cores if tiles_total >= num_cores else 1
        tiles_per_split = pl.cdiv(tiles_total, num_splits)
        covered_rows = num_splits * tiles_per_split * tile_rows
        needs_mask = covered_rows > rows_full

        if n % LANES == 0:
            x2 = x.reshape(rows_full, LANES)  # free reshape, no copy
            t2 = t.reshape(rows_full, LANES)
        else:
            x2 = x[: rows_full * LANES].reshape(rows_full, LANES)
            t2 = t[: rows_full * LANES].reshape(rows_full, LANES)

        is_v7 = "v7" in kind
        buffer_count = 3 if is_v7 else None
        vmem_limit = 48 * 1024 * 1024 if is_v7 else None
        # v5e's default scoped VMEM is 16 MiB; raise it if blocks ever grow.
        per_step_bytes = tile_rows * LANES * (
            x.dtype.itemsize + t.dtype.itemsize)
        if vmem_limit is None and per_step_bytes * 2 > 12 * 1024 * 1024:
            vmem_limit = 48 * 1024 * 1024

        inter, s_in, s_tgt = _dice_sums_pallas(
            x2, t2,
            tile_rows=tile_rows, tiles_per_split=tiles_per_split,
            num_splits=num_splits, rows_full=rows_full,
            needs_mask=needs_mask, buffer_count=buffer_count,
            vmem_limit=vmem_limit)

    # Only the <128-element lane remainder (or an entirely tiny input) is left
    # to plain JAX; it fuses with the final scalar math under jit.
    # TODO(synk): lane remainder could also be folded in via a lane mask if a
    # zero-copy (ceil(n/128), 128) view of the flat array becomes available.
    tail_start = rows_kernel * LANES
    if tail_start < n:
        x_tail = x[tail_start:].astype(jnp.float32)
        t_tail = t[tail_start:].astype(jnp.float32)
        s_tail = jax.nn.sigmoid(x_tail)
        inter = inter + jnp.sum(s_tail * t_tail)
        s_in = s_in + jnp.sum(s_tail)
        s_tgt = s_tgt + jnp.sum(t_tail)

    dice = (2.0 * inter + smooth) / (s_in + s_tgt + smooth)
    return 1.0 - dice


def _dice_loss_ref(inputs, targets, smooth=1.0):
    x = jax.nn.sigmoid(inputs.astype(jnp.float32)).reshape(-1)
    t = targets.reshape(-1).astype(jnp.float32)
    inter = jnp.sum(x * t)
    dice = (2.0 * inter + smooth) / (jnp.sum(x) + jnp.sum(t) + smooth)
    return 1.0 - dice


if __name__ == "__main__":
    key = jax.random.PRNGKey(0)
    k1, k2 = jax.random.split(key)

    # NCHW-shaped logits / binary targets, flattened inside the loss.
    inputs = jax.random.normal(k1, (2, 4, 16, 16), dtype=jnp.float32)
    targets = (jax.random.uniform(k2, (2, 4, 16, 16)) > 0.5).astype(jnp.float32)

    loss = jax.block_until_ready(dice_loss_old(inputs, targets, 1.0))
    ref = jax.block_until_ready(_dice_loss_ref(inputs, targets, 1.0))
    assert jnp.allclose(loss, ref, atol=1e-5, rtol=1e-5), (loss, ref)

    # Exercise the masked partial-tile + lane-remainder path (non-aligned N).
    k3, k4 = jax.random.split(k2)
    xb = jax.random.normal(k3, (3, 5, 17, 19), dtype=jnp.float32)
    tb = (jax.random.uniform(k4, (3, 5, 17, 19)) > 0.5).astype(jnp.float32)
    loss2 = jax.block_until_ready(dice_loss_old(xb, tb, 1.0))
    ref2 = jax.block_until_ready(_dice_loss_ref(xb, tb, 1.0))
    assert jnp.allclose(loss2, ref2, atol=1e-5, rtol=1e-5), (loss2, ref2)

    print("KERNEL_OK")
</pallas_src>

<mosaic_0001>
module attributes {stable_mosaic.version = 11 : i64} {
  func.func @kernel(%arg0: i32, %arg1: i32, %arg2: memref<16x128xf32, #tpu.memory_space<vmem>>, %arg3: memref<16x128xf32, #tpu.memory_space<vmem>>, %arg4: memref<1x3x128xf32, #tpu.memory_space<vmem>>) attributes {dimension_semantics = [#tpu.dimension_semantics<parallel>, #tpu.dimension_semantics<arbitrary>], iteration_bounds = array<i64: 1, 1>, scalar_prefetch = 0 : i64, scratch_operands = 0 : i64, tpu.core_type = #tpu.core_type<tc>, window_params = [{transform_indices = @transform_0, window_bounds = array<i64: 16, 128>}, {transform_indices = @transform_1, window_bounds = array<i64: 16, 128>}, {transform_indices = @transform_2, window_bounds = array<i64: 1, 3, 128>}]} {
    %c0_i32 = arith.constant 0 : i32
    %0 = arith.cmpi eq, %arg1, %c0_i32 : i32
    %1 = arith.extui %0 : i1 to i32
    %c0_i32_0 = arith.constant 0 : i32
    %2 = arith.cmpi ne, %1, %c0_i32_0 : i32
    scf.if %2 {
      %cst_13 = arith.constant 0.000000e+00 : f32
      %22 = vector.broadcast %cst_13 : f32 to vector<1x3x128xf32>
      %c0_14 = arith.constant 0 : index
      %c0_15 = arith.constant 0 : index
      %c0_16 = arith.constant 0 : index
      %23 = vector.load %arg4[%c0_14, %c0_15, %c0_16] : memref<1x3x128xf32, #tpu.memory_space<vmem>>, vector<1x3x128xf32>
      tpu.vector_store %arg4[%c0_14, %c0_15, %c0_16], %22 {strides = array<i32>} : memref<1x3x128xf32, #tpu.memory_space<vmem>>, vector<1x3x128xf32>,
    } else {
    }
    %c0 = arith.constant 0 : index
    %c0_1 = arith.constant 0 : index
    %3 = vector.load %arg2[%c0, %c0_1] : memref<16x128xf32, #tpu.memory_space<vmem>>, vector<16x128xf32>
    %c0_2 = arith.constant 0 : index
    %c0_3 = arith.constant 0 : index
    %4 = vector.load %arg3[%c0_2, %c0_3] : memref<16x128xf32, #tpu.memory_space<vmem>>, vector<16x128xf32>
    %5 = arith.negf %3 : vector<16x128xf32>
    %6 = math.exp %5 : vector<16x128xf32>
    %cst = arith.constant 1.000000e+00 : f32
    %7 = vector.broadcast %cst : f32 to vector<16x128xf32>
    %8 = arith.addf %7, %6 : vector<16x128xf32>
    %9 = arith.divf %7, %8 : vector<16x128xf32>
    %10 = arith.mulf %9, %4 : vector<16x128xf32>
    %cst_4 = arith.constant dense<0.000000e+00> : vector<128xf32>
    %11 = vector.multi_reduction <add>, %10, %cst_4 [0] : vector<16x128xf32> to vector<128xf32>
    %12 = vector.shape_cast %11 : vector<128xf32> to vector<1x128xf32>
    %cst_5 = arith.constant dense<0.000000e+00> : vector<128xf32>
    %13 = vector.multi_reduction <add>, %9, %cst_5 [0] : vector<16x128xf32> to vector<128xf32>
    %14 = vector.shape_cast %13 : vector<128xf32> to vector<1x128xf32>
    %cst_6 = arith.constant dense<0.000000e+00> : vector<128xf32>
    %15 = vector.multi_reduction <add>, %4, %cst_6 [0] : vector<16x128xf32> to vector<128xf32>
    %16 = vector.shape_cast %15 : vector<128xf32> to vector<1x128xf32>
    %c0_7 = arith.constant 0 : index
    %c0_8 = arith.constant 0 : index
    %c0_9 = arith.constant 0 : index
    %17 = vector.load %arg4[%c0_7, %c0_8, %c0_9] : memref<1x3x128xf32, #tpu.memory_space<vmem>>, vector<1x3x128xf32>
    %18 = tpu.concatenate %12, %14, %16 in 0 : vector<1x128xf32>, vector<1x128xf32>, vector<1x128xf32> -> vector<3x128xf32>
    %19 = vector.shape_cast %18 : vector<3x128xf32> to vector<1x3x128xf32>
    %20 = arith.addf %17, %19 : vector<1x3x128xf32>
    %c0_10 = arith.constant 0 : index
    %c0_11 = arith.constant 0 : index
    %c0_12 = arith.constant 0 : index
    %21 = vector.load %arg4[%c0_10, %c0_11, %c0_12] : memref<1x3x128xf32, #tpu.memory_space<vmem>>, vector<1x3x128xf32>
    tpu.vector_store %arg4[%c0_10, %c0_11, %c0_12], %20 {strides = array<i32>} : memref<1x3x128xf32, #tpu.memory_space<vmem>>, vector<1x3x128xf32>,
    return
  }
  func.func @transform_0(%arg0: i32, %arg1: i32) -> (i32, i32) {
    %c1_i32 = arith.constant 1 : i32
    %0 = arith.muli %arg0, %c1_i32 : i32
    %1 = arith.addi %0, %arg1 : i32
    %c0_i32 = arith.constant 0 : i32
    %2 = arith.minsi %1, %c0_i32 : i32
    %c0_i32_0 = arith.constant 0 : i32
    %c0_i32_1 = arith.constant 0 : i32
    return %2, %c0_i32_0 : i32, i32
  }
  func.func @transform_1(%arg0: i32, %arg1: i32) -> (i32, i32) {
    %c1_i32 = arith.constant 1 : i32
    %0 = arith.muli %arg0, %c1_i32 : i32
    %1 = arith.addi %0, %arg1 : i32
    %c0_i32 = arith.constant 0 : i32
    %2 = arith.minsi %1, %c0_i32 : i32
    %c0_i32_0 = arith.constant 0 : i32
    %c0_i32_1 = arith.constant 0 : i32
    return %2, %c0_i32_0 : i32, i32
  }
  func.func @transform_2(%arg0: i32, %arg1: i32) -> (i32, i32, i32) {
    %c0_i32 = arith.constant 0 : i32
    %c0_i32_0 = arith.constant 0 : i32
    %c0_i32_1 = arith.constant 0 : i32
    return %arg0, %c0_i32, %c0_i32_0 : i32, i32, i32
  }
}

</mosaic_0001>

<bundles_post_ra>
// kernel: dice_loss_old.1
= control target key start
LH: loop header
LB: loop body
LE: loop exit
PB: predicated region body
PF: predicated region fallthrough
CT: control target
= control target key end

     0   :  { %v179_v0 = vmov 0.0   ;;  %vm146_vm8 = vcmask 1040384   ;;  %vm148_vm9 = vcmask 1041408   ;;  %s216_s2 = inlined_call_operand.vmem [shape: f32[1,3,128], index: 2, kind: output, shape index: {}]   ;;  %s217_s0 = inlined_call_operand.vmem [shape: f32[16,128], index: 0, kind: input, shape index: {}]   ;;  %s218_s1 = inlined_call_operand.vmem [shape: f32[16,128], index: 1, kind: input, shape index: {}]  }
   0x1   :  { %79 = vst [vmem:[%s216_s2] sm:$0x7] %v179_v0  ;;  %v80_v1 = vld [vmem:[%s217_s0] sm:$0xff]  ;;  %v81_v2 = vld [vmem:[%s217_s0 + $0x8] sm:$0xff] }
   0x2   :  { %v168_v3 = vmul.f32 -1.442695, %v80_v1  ;;  %v169_v4 = vmul.f32 -1.442695, %v81_v2  ;;  %v82_v10 = vld [vmem:[%s218_s1] sm:$0xff]  ;;  %v83_v11 = vld [vmem:[%s218_s1 + $0x8] sm:$0xff] }
   0x3   :  { %v138_v14 = vadd.f32 %v83_v11, %v82_v10 }
   0x4   :  { %171 = vpow2.f32 %v168_v3 }
   0x5   :  { %173 = vpow2.f32 %v169_v4  ;;  %v139_v23 = vrot.slane %v138_v14, 4 }
   0x7   :  { %v140_v30 = vadd.f32 %v139_v23, %v138_v14 }
   0x8   :  { %v145_v54 = vld [vmem:[%s216_s2] sm:$0x7] }
   0x9   :  { %v141_v37 = vrot.slane %v140_v30, 2 }
   0xa   :  { %v172_v5 = vpop.eup %171 }
   0xb   :  { %v174_v6 = vpop.eup %173  ;;  %v90_v7 = vadd.f32 1.0, %v172_v5  ;;  %v142_v42 = vadd.f32 %v141_v37, %v140_v30 }
   0xc   :  { %v91_v8 = vadd.f32 1.0, %v174_v6 }
   0xd   :  { %175 = vrcp.f32 %v90_v7  ;;  %vm97_vm0 = vweird.f32 %v90_v7  ;;  %v103_v15 = vand.u32 2147483648, %v90_v7  ;;  %v101_v18 = vand.u32 2147483647, %v90_v7 }
   0xe   :  { %177 = vrcp.f32 %v91_v8  ;;  %v118_v19 = vand.u32 2147483648, %v91_v8  ;;  %vm112_vm2 = vweird.f32 %v91_v8  ;;  %v116_v21 = vand.u32 2147483647, %v91_v8 }
   0xf   :  { %v104_v24 = vor.u32 1.1754944e-38, %v103_v15  ;;  %vm102_vm5 = vcmp.eq.f32.partialorder %v101_v18, 8.507059e+37  ;;  %v143_v47 = vrot.slane %v142_v42, 1 }
  0x10   :  { %v119_v27 = vor.u32 1.1754944e-38, %v118_v19  ;;  %vm117_vm7 = vcmp.eq.f32.partialorder %v116_v21, 8.507059e+37 }
  0x11   :  { %v144_v52 = vadd.f32 %v143_v47, %v142_v42 }
  0x13   :  { %v176_v9 = vpop.eup %175 }
  0x14   :  { %v178_v12 = vpop.eup %177  ;;  %v93_v13 = vmul.f32 %v176_v9, %v90_v7  ;;  %vm98_vm1 = vweird.f32 %v176_v9 }
  0x15   :  { %v108_v16 = vmul.f32 %v178_v12, %v91_v8  ;;  %vm113_vm3 = vweird.f32 %v178_v12  ;;  %vm99_vm4 = vmor %vm97_vm0, %vm98_vm1 }
  0x16   :  { %v94_v17 = vsub.f32 1.0, %v93_v13  ;;  %vm114_vm6 = vmor %vm112_vm2, %vm113_vm3 }
  0x17   :  { %v109_v20 = vsub.f32 1.0, %v108_v16 }
  0x18   :  { %v95_v22 = vmul.f32 %v176_v9, %v94_v17 }
  0x19   :  { %v110_v25 = vmul.f32 %v178_v12, %v109_v20 }
  0x1a   :  { %v96_v26 = vadd.f32 %v176_v9, %v95_v22 }
  0x1b   :  { %v111_v28 = vadd.f32 %v178_v12, %v110_v25 }
  0x1c   :  { %v100_v29 = vsel %vm99_vm4, %v176_v9, %v96_v26 }
  0x1d   :  { %v105_v31 = vsel %vm102_vm5, %v104_v24, %v100_v29  ;;  %v115_v32 = vsel %vm114_vm6, %v178_v12, %v111_v28 }
  0x1e   :  { %v120_v33 = vsel %vm117_vm7, %v119_v27, %v115_v32  ;;  %v122_v34 = vmul.f32 %v105_v31, %v82_v10 }
  0x1f   :  { %v123_v35 = vmul.f32 %v120_v33, %v83_v11  ;;  %v131_v36 = vadd.f32 %v120_v33, %v105_v31 }
  0x21   :  { %v124_v38 = vadd.f32 %v123_v35, %v122_v34  ;;  %v132_v39 = vrot.slane %v131_v36, 4 }
  0x23   :  { %v125_v40 = vrot.slane %v124_v38, 4  ;;  %v133_v41 = vadd.f32 %v132_v39, %v131_v36 }
  0x25   :  { %v126_v43 = vadd.f32 %v125_v40, %v124_v38  ;;  %v134_v44 = vrot.slane %v133_v41, 2 }
  0x27   :  { %v127_v45 = vrot.slane %v126_v43, 2  ;;  %v135_v46 = vadd.f32 %v134_v44, %v133_v41 }
  0x29   :  { %v128_v48 = vadd.f32 %v127_v45, %v126_v43  ;;  %v136_v49 = vrot.slane %v135_v46, 1 }
  0x2b   :  { %v129_v50 = vrot.slane %v128_v48, 1  ;;  %v137_v51 = vadd.f32 %v136_v49, %v135_v46 }
  0x2d   :  { %v130_v53 = vadd.f32 %v129_v50, %v128_v48 }
  0x2f   :  { %v147_v55 = vsel %vm146_vm8, %v130_v53, %v137_v51 }
  0x30   :  { %v149_v56 = vsel %vm148_vm9, %v147_v55, %v144_v52 }
  0x31   :  { %v150_v57 = vadd.f32 %v149_v56, %v145_v54 }
  0x33   :  { %151 = vst [vmem:[%s216_s2] sm:$0x7] %v150_v57 }

</bundles_post_ra>
